<compile_context>
chip_gen: v6e
topology: v6e:2x2x1
jax: 0.10.0
libtpu: 0.0.40
codegen_flags: <defaults>
</compile_context>

<pallas_src>
import functools
import math

import jax
import jax.numpy as jnp
from jax.experimental import pallas as pl
from jax.experimental.pallas import tpu as pltpu


def _round_up(a: int, b: int) -> int:
    return ((a + b - 1) // b) * b


def _gelu_exact(x):
    # nn.GELU() default is the exact erf formulation (PyTorch parity).
    return 0.5 * x * (1.0 + jax.lax.erf(x * (1.0 / math.sqrt(2.0))))


@functools.lru_cache(maxsize=None)
def _bf16_elementwise_ok() -> bool:
    # v6e/v7x have bf16-capable VPU+EUP; keep f32 elementwise on <= v5e.
    try:
        kind = jax.devices()[0].device_kind.lower()
    except Exception:
        return False
    return not any(t in kind for t in ("v2", "v3", "v4", "v5"))


# ----------------------------------------------------------------------------
# Kernels
# ----------------------------------------------------------------------------
def _mlp_kernel_resident(x_ref, w1_ref, b1_ref, w2_ref, b2_ref, o_ref, *,
                         ew_dtype):
    """Grid = (row_tiles,) [parallel].  W1/W2 fully resident; no scratch."""
    # fc1 on MXU (bf16 inputs, f32 accumulation).
    h = jnp.dot(x_ref[...], w1_ref[...], preferred_element_type=jnp.float32)
    # bias + exact GELU (bf16 on v6e/v7x, f32 on v5e).
    h = _gelu_exact((h + b1_ref[...]).astype(ew_dtype))
    # dropout(p=0.0) is the identity -> no-op.
    o = jnp.dot(h.astype(jnp.bfloat16), w2_ref[...],
                preferred_element_type=jnp.float32)
    o_ref[...] = (o + b2_ref[...]).astype(o_ref.dtype)


def _mlp_kernel_chunked(x_ref, w1_ref, b1_ref, w2_ref, b2_ref, o_ref, acc_ref,
                        *, ew_dtype):
    """Fallback for very large H.  Grid = (row_tiles [parallel],
    hidden_chunks [arbitrary, reduction]); f32 VMEM accumulator."""
    h_idx = pl.program_id(1)

    @pl.when(h_idx == 0)
    def _init():
        acc_ref[...] = jnp.zeros_like(acc_ref)

    h = jnp.dot(x_ref[...], w1_ref[...], preferred_element_type=jnp.float32)
    h = _gelu_exact((h + b1_ref[...]).astype(ew_dtype))
    acc_ref[...] += jnp.dot(h.astype(jnp.bfloat16), w2_ref[...],
                            preferred_element_type=jnp.float32)

    @pl.when(h_idx == pl.num_programs(1) - 1)
    def _finalize():
        o_ref[...] = (acc_ref[...] + b2_ref[...]).astype(o_ref.dtype)


# ----------------------------------------------------------------------------
# Wrapper
# ----------------------------------------------------------------------------
def prepare_mlp_params(w1, b1, w2, b2, *,
                       weight_vmem_budget_bytes=24 << 20,
                       h_chunk_cap=1024):
    """One-time parameter prep (hoisted out of the per-forward hot path):
    bf16 cast and, only when the weights truly exceed the VMEM budget,
    hidden-dim chunk selection (+ padding only if no exact divisor exists).

    w1: (C_in, H), b1: (H,), w2: (H, C_out), b2: (C_out,)."""
    C_in, H = w1.shape
    C_out = w2.shape[1]

    # Worst-case VMEM for the two weight matrices (bf16, double-buffered).
    w_bytes = 2 * 2 * (C_in * H + H * C_out)
    if w_bytes <= weight_vmem_budget_bytes or H < 256:
        # Common path for all PVT stages (H <= 2048, C <= 512 => ~4 MB bf16):
        # keep the full weights resident, no chunking, no padding.
        h_tile, H_pad, chunked = H, H, False
    else:
        # Prefer an exact divisor of H that is a multiple of 128 (no padded
        # MXU flops / HBM bytes); pad only if none exists.
        cap = max(128, h_chunk_cap - h_chunk_cap % 128)
        h_tile = 0
        for cand in range(cap, 0, -128):
            if H % cand == 0:
                h_tile = cand
                break
        if h_tile:
            H_pad = H
        else:
            h_tile = cap
            H_pad = _round_up(H, h_tile)
        chunked = True

    if H_pad != H:
        # Zero-padded hidden units are exactly inert: b1 pad 0 => GELU(0) = 0.
        w1 = jnp.pad(w1, ((0, 0), (0, H_pad - H)))
        b1 = jnp.pad(b1, ((0, H_pad - H),))
        w2 = jnp.pad(w2, ((0, H_pad - H), (0, 0)))

    return dict(
        w1=w1.astype(jnp.bfloat16),                       # (C_in, H_pad)
        b1=b1.reshape(1, H_pad).astype(jnp.float32),      # (1, H_pad)
        w2=w2.astype(jnp.bfloat16),                       # (H_pad, C_out)
        b2=b2.reshape(1, C_out).astype(jnp.float32),      # (1, C_out)
        h_tile=h_tile,
        chunked=chunked,
    )


def _vmem_limit_bytes(rt, c_in, h_tile, c_out, out_itemsize, chunked):
    nbuf = 2                                   # Pallas default double-buffering
    b = 0
    b += nbuf * rt * c_in * 2                  # x tile (bf16)
    b += nbuf * c_in * h_tile * 2              # W1 (bf16)
    b += nbuf * h_tile * 4                     # b1 (f32)
    b += nbuf * h_tile * c_out * 2             # W2 (bf16)
    b += nbuf * c_out * 4                      # b2 (f32)
    b += nbuf * rt * c_out * out_itemsize      # output tile
    if chunked:
        b += rt * c_out * 4                    # f32 accumulator scratch
    b += rt * h_tile * 6                       # f32 intermediate + bf16 copy
    # 50% headroom + 4 MiB compiler scratch; clamp for v7x (64 MiB/TC).
    return int(min(max(b * 3 // 2 + (4 << 20), 8 << 20), 48 << 20))


def mlp_forward(x, params, *, row_tile=512, ew_bf16=None):
    """x: (B, N, C_in); params from prepare_mlp_params()."""
    w1_bf, b1_2d = params["w1"], params["b1"]
    w2_bf, b2_2d = params["w2"], params["b2"]
    h_tile, chunked = params["h_tile"], params["chunked"]

    B, N, C_in = x.shape
    H_pad = w1_bf.shape[1]
    C_out = w2_bf.shape[1]
    M = B * N
    out_dtype = x.dtype
    out_itemsize = jnp.dtype(out_dtype).itemsize

    if ew_bf16 is None:
        ew_bf16 = _bf16_elementwise_ok()
    ew_dtype = jnp.bfloat16 if ew_bf16 else jnp.float32

    # Row tile: multiple of 16 (bf16 sublane packing), sized so there are
    # always >= 2 row tiles (v7x megacore sharding of the "parallel" axis),
    # capped at row_tile.  No full-activation padding: cdiv grid + masked
    # boundary block handles the remainder; garbage overhang rows only feed
    # their own masked-out output rows.
    rt = min(row_tile, max(16, _round_up(pl.cdiv(M, 2), 16)))
    x2d = x.reshape(M, C_in)
    if M < rt:                                 # tiny inputs only (<= 15 rows)
        x2d = jnp.pad(x2d, ((0, rt - M), (0, 0)))
    M_arr = x2d.shape[0]
    n_rows = pl.cdiv(M_arr, rt)
    x_bf = x2d.astype(jnp.bfloat16)

    n_h = H_pad // h_tile
    weight_bytes = (w1_bf.size + w2_bf.size) * 2
    weight_streams = 1 if not chunked else n_rows
    cost = pl.CostEstimate(
        flops=2 * M_arr * (C_in * H_pad + H_pad * C_out),
        transcendentals=M_arr * H_pad,
        bytes_accessed=(x_bf.size * 2 + weight_bytes * weight_streams
                        + b1_2d.size * 4 + b2_2d.size * 4
                        + M_arr * C_out * out_itemsize),
    )
    vmem_limit = _vmem_limit_bytes(rt, C_in, h_tile, C_out, out_itemsize,
                                   chunked)

    if not chunked:
        out2d = pl.pallas_call(
            functools.partial(_mlp_kernel_resident, ew_dtype=ew_dtype),
            out_shape=jax.ShapeDtypeStruct((M_arr, C_out), out_dtype),
            grid_spec=pltpu.PrefetchScalarGridSpec(
                num_scalar_prefetch=0,
                grid=(n_rows,),
                in_specs=[
                    pl.BlockSpec((rt, C_in), lambda i: (i, 0)),       # x rows
                    pl.BlockSpec((C_in, H_pad), lambda i: (0, 0)),    # W1 (resident)
                    pl.BlockSpec((1, H_pad), lambda i: (0, 0)),       # b1
                    pl.BlockSpec((H_pad, C_out), lambda i: (0, 0)),   # W2 (resident)
                    pl.BlockSpec((1, C_out), lambda i: (0, 0)),       # b2
                ],
                out_specs=pl.BlockSpec((rt, C_out), lambda i: (i, 0)),
            ),
            compiler_params=pltpu.CompilerParams(
                dimension_semantics=("parallel",),
                vmem_limit_bytes=vmem_limit),
            cost_estimate=cost,
        )(x_bf, w1_bf, b1_2d, w2_bf, b2_2d)
    else:
        out2d = pl.pallas_call(
            functools.partial(_mlp_kernel_chunked, ew_dtype=ew_dtype),
            out_shape=jax.ShapeDtypeStruct((M_arr, C_out), out_dtype),
            grid_spec=pltpu.PrefetchScalarGridSpec(
                num_scalar_prefetch=0,
                grid=(n_rows, n_h),
                in_specs=[
                    pl.BlockSpec((rt, C_in), lambda i, h: (i, 0)),
                    pl.BlockSpec((C_in, h_tile), lambda i, h: (0, h)),
                    pl.BlockSpec((1, h_tile), lambda i, h: (0, h)),
                    pl.BlockSpec((h_tile, C_out), lambda i, h: (h, 0)),
                    pl.BlockSpec((1, C_out), lambda i, h: (0, 0)),
                ],
                out_specs=pl.BlockSpec((rt, C_out), lambda i, h: (i, 0)),
                scratch_shapes=[pltpu.VMEM((rt, C_out), jnp.float32)],
            ),
            compiler_params=pltpu.CompilerParams(
                dimension_semantics=("parallel", "arbitrary"),
                vmem_limit_bytes=vmem_limit),
            cost_estimate=cost,
        )(x_bf, w1_bf, b1_2d, w2_bf, b2_2d)

    return out2d[:M].reshape(B, N, C_out)


def reference_mlp(x, w1, b1, w2, b2):
    h = _gelu_exact(jnp.dot(x, w1) + b1)
    return jnp.dot(h, w2) + b2


if __name__ == "__main__":
    key = jax.random.PRNGKey(0)
    k = jax.random.split(key, 10)

    # --- Case A: tiny PVT-Mlp shapes, weight-resident (single-h-step) path ---
    B, N, C_in = 2, 8, 4
    hidden = 32
    C_out = C_in  # out_features defaults to in_features
    x = jax.random.normal(k[0], (B, N, C_in), dtype=jnp.float32)
    w1 = jax.random.normal(k[1], (C_in, hidden), dtype=jnp.float32) * 0.1
    b1 = jax.random.normal(k[2], (hidden,), dtype=jnp.float32) * 0.1
    w2 = jax.random.normal(k[3], (hidden, C_out), dtype=jnp.float32) * 0.1
    b2 = jax.random.normal(k[4], (C_out,), dtype=jnp.float32) * 0.1

    params = prepare_mlp_params(w1, b1, w2, b2)
    out = jax.block_until_ready(mlp_forward(x, params))
    ref = reference_mlp(x, w1, b1, w2, b2)
    assert out.shape == (B, N, C_out)
    # bf16 MXU path vs f32 reference -> relaxed tolerance (mixed precision).
    assert jnp.allclose(out, ref, atol=2e-2, rtol=2e-2), "case A mismatch"

    # --- Case B: forced hidden-chunked fallback + non-divisible row count ----
    B2, N2, C2, H2 = 1, 20, 16, 256
    x2 = jax.random.normal(k[5], (B2, N2, C2), dtype=jnp.float32)
    w1b = jax.random.normal(k[6], (C2, H2), dtype=jnp.float32) * 0.1
    b1b = jax.random.normal(k[7], (H2,), dtype=jnp.float32) * 0.1
    w2b = jax.random.normal(k[8], (H2, C2), dtype=jnp.float32) * 0.1
    b2b = jax.random.normal(k[9], (C2,), dtype=jnp.float32) * 0.1
    params_b = prepare_mlp_params(w1b, b1b, w2b, b2b,
                                  weight_vmem_budget_bytes=1, h_chunk_cap=128)
    out2 = jax.block_until_ready(mlp_forward(x2, params_b))
    ref2 = reference_mlp(x2, w1b, b1b, w2b, b2b)
    assert out2.shape == (B2, N2, C2)
    assert jnp.allclose(out2, ref2, atol=2e-2, rtol=2e-2), "case B mismatch"

    print("KERNEL_OK")
</pallas_src>

<mosaic_0001>
module attributes {stable_mosaic.version = 11 : i64} {
  func.func @_mlp_kernel_resident(%arg0: i32, %arg1: memref<16x4xbf16, #tpu.memory_space<vmem>>, %arg2: memref<4x32xbf16, #tpu.memory_space<vmem>>, %arg3: memref<1x32xf32, #tpu.memory_space<vmem>>, %arg4: memref<32x4xbf16, #tpu.memory_space<vmem>>, %arg5: memref<1x4xf32, #tpu.memory_space<vmem>>, %arg6: memref<16x4xf32, #tpu.memory_space<vmem>>) attributes {dimension_semantics = [#tpu.dimension_semantics<parallel>], iteration_bounds = array<i64: 1>, scalar_prefetch = 0 : i64, scratch_operands = 0 : i64, tpu.core_type = #tpu.core_type<tc>, window_params = [{transform_indices = @transform_0, window_bounds = array<i64: 16, 4>}, {pipeline_mode = #tpu.pipeline_mode<synchronous>, transform_indices = @transform_1, window_bounds = array<i64: 4, 32>}, {pipeline_mode = #tpu.pipeline_mode<synchronous>, transform_indices = @transform_2, window_bounds = array<i64: 1, 32>}, {pipeline_mode = #tpu.pipeline_mode<synchronous>, transform_indices = @transform_3, window_bounds = array<i64: 32, 4>}, {pipeline_mode = #tpu.pipeline_mode<synchronous>, transform_indices = @transform_4, window_bounds = array<i64: 1, 4>}, {transform_indices = @transform_5, window_bounds = array<i64: 16, 4>}]} {
    %c0 = arith.constant 0 : index
    %c0_0 = arith.constant 0 : index
    %0 = vector.load %arg1[%c0, %c0_0] : memref<16x4xbf16, #tpu.memory_space<vmem>>, vector<16x4xbf16>
    %c0_1 = arith.constant 0 : index
    %c0_2 = arith.constant 0 : index
    %1 = vector.load %arg2[%c0_1, %c0_2] : memref<4x32xbf16, #tpu.memory_space<vmem>>, vector<4x32xbf16>
    %cst = arith.constant dense<0.000000e+00> : vector<16x32xf32>
    %2 = tpu.matmul %0, %1, %cst {dimension_numbers = #tpu.dot_dimension_numbers<[1], [0], [0], [1], [0, 0, 1, 1], [], []>} : vector<16x4xbf16>, vector<4x32xbf16>, vector<16x32xf32> -> vector<16x32xf32>
    %c0_3 = arith.constant 0 : index
    %c0_4 = arith.constant 0 : index
    %3 = vector.load %arg3[%c0_3, %c0_4] : memref<1x32xf32, #tpu.memory_space<vmem>>, vector<1x32xf32>
    %4 = vector.broadcast %3 : vector<1x32xf32> to vector<16x32xf32>
    %5 = arith.addf %2, %4 : vector<16x32xf32>
    %6 = arith.truncf %5 : vector<16x32xf32> to vector<16x32xbf16>
    %cst_5 = arith.constant 5.000000e-01 : bf16
    %7 = vector.broadcast %cst_5 : bf16 to vector<16x32xbf16>
    %8 = arith.mulf %7, %6 : vector<16x32xbf16>
    %cst_6 = arith.constant 7.070310e-01 : bf16
    %9 = vector.broadcast %cst_6 : bf16 to vector<16x32xbf16>
    %10 = arith.mulf %6, %9 : vector<16x32xbf16>
    %11 = math.erf %10 : vector<16x32xbf16>
    %cst_7 = arith.constant 1.000000e+00 : bf16
    %12 = vector.broadcast %cst_7 : bf16 to vector<16x32xbf16>
    %13 = arith.addf %12, %11 : vector<16x32xbf16>
    %14 = arith.mulf %8, %13 : vector<16x32xbf16>
    %c0_8 = arith.constant 0 : index
    %c0_9 = arith.constant 0 : index
    %15 = vector.load %arg4[%c0_8, %c0_9] : memref<32x4xbf16, #tpu.memory_space<vmem>>, vector<32x4xbf16>
    %cst_10 = arith.constant dense<0.000000e+00> : vector<16x4xf32>
    %16 = tpu.matmul %14, %15, %cst_10 {dimension_numbers = #tpu.dot_dimension_numbers<[1], [0], [0], [1], [0, 0, 1, 1], [], []>} : vector<16x32xbf16>, vector<32x4xbf16>, vector<16x4xf32> -> vector<16x4xf32>
    %c0_11 = arith.constant 0 : index
    %c0_12 = arith.constant 0 : index
    %17 = vector.load %arg5[%c0_11, %c0_12] : memref<1x4xf32, #tpu.memory_space<vmem>>, vector<1x4xf32>
    %18 = vector.broadcast %17 : vector<1x4xf32> to vector<16x4xf32>
    %19 = arith.addf %16, %18 : vector<16x4xf32>
    %c0_13 = arith.constant 0 : index
    %c0_14 = arith.constant 0 : index
    %20 = vector.load %arg6[%c0_13, %c0_14] : memref<16x4xf32, #tpu.memory_space<vmem>>, vector<16x4xf32>
    tpu.vector_store %arg6[%c0_13, %c0_14], %19 {strides = array<i32>} : memref<16x4xf32, #tpu.memory_space<vmem>>, vector<16x4xf32>,
    return
  }
  func.func @transform_0(%arg0: i32) -> (i32, i32) {
    %c0_i32 = arith.constant 0 : i32
    %c0_i32_0 = arith.constant 0 : i32
    return %arg0, %c0_i32 : i32, i32
  }
  func.func @transform_1(%arg0: i32) -> (i32, i32) {
    %c0_i32 = arith.constant 0 : i32
    %c0_i32_0 = arith.constant 0 : i32
    %c0_i32_1 = arith.constant 0 : i32
    return %c0_i32, %c0_i32_0 : i32, i32
  }
  func.func @transform_2(%arg0: i32) -> (i32, i32) {
    %c0_i32 = arith.constant 0 : i32
    %c0_i32_0 = arith.constant 0 : i32
    %c0_i32_1 = arith.constant 0 : i32
    return %c0_i32, %c0_i32_0 : i32, i32
  }
  func.func @transform_3(%arg0: i32) -> (i32, i32) {
    %c0_i32 = arith.constant 0 : i32
    %c0_i32_0 = arith.constant 0 : i32
    %c0_i32_1 = arith.constant 0 : i32
    return %c0_i32, %c0_i32_0 : i32, i32
  }
  func.func @transform_4(%arg0: i32) -> (i32, i32) {
    %c0_i32 = arith.constant 0 : i32
    %c0_i32_0 = arith.constant 0 : i32
    %c0_i32_1 = arith.constant 0 : i32
    return %c0_i32, %c0_i32_0 : i32, i32
  }
  func.func @transform_5(%arg0: i32) -> (i32, i32) {
    %c0_i32 = arith.constant 0 : i32
    %c0_i32_0 = arith.constant 0 : i32
    return %arg0, %c0_i32 : i32, i32
  }
}

</mosaic_0001>

<bundles_post_ra>
// kernel: tpu_custom_call.1
= control target key start
LH: loop header
LB: loop body
LE: loop exit
PB: predicated region body
PF: predicated region fallthrough
CT: control target
= control target key end

     0   :  { %vm43_vm0 = vcmask 1041408   ;;  %v201_v0 = vmov 0.0   ;;  %vm202_vm1 = vmmov 0   ;;  %vm39_vm2 = vcmask 31744   ;;  %s260_s1 = inlined_call_operand.vmem [shape: bf16[4,32], index: 1, kind: input, shape index: {}]   ;;  %s261_s0 = inlined_call_operand.vmem [shape: bf16[16,4], index: 0, kind: input, shape index: {}]   ;;  %s262_s3 = inlined_call_operand.vmem [shape: bf16[32,4], index: 3, kind: input, shape index: {}]   ;;  %s263_s2 = inlined_call_operand.vmem [shape: f32[1,32], index: 2, kind: input, shape index: {}]   ;;  %s264_s4 = inlined_call_operand.vmem [shape: f32[1,4], index: 4, kind: input, shape index: {}]   ;;  %s265_s5 = inlined_call_operand.vmem [shape: f32[16,4], index: 5, kind: output, shape index: {}]  }
   0x1   :  { %180 = vmatprep.subr.bf16.mxu0 %v201_v0  ;;  %v26_v1 = vld [vmem:[%s260_s1] sm:$0x3]  ;;  %182 = vmatprep.mubr.msk.bf16.mxu0 %vm202_vm1, %v201_v0  ;;  %v197_v4 = vld [vmem:[%s262_s3 + $0x8] sm:$0xff]   ;;  %vm117_vm3 = vcmask 261120  }
   0x2   :  { %v45_v2 = vsel %vm43_vm0, %v26_v1, 0  ;;  %v196_v3 = vld [vmem:[%s261_s0] sm:$0xff]   ;;  %186 = vmatprep.subr.bf16.mxu1 %v201_v0  ;;  %190 = vmatprep.mubr.msk.bf16.mxu1 %vm202_vm1, %v201_v0 }
   0x3   :  { %181 = vmatpush3.bf16.msra.mxu0 %v45_v2  ;;  %187 = vmatpush3.bf16.msra.mxu1 %v197_v4  ;;  %v198_v5 = vld [vmem:[%s262_s3] sm:$0xff]  }
   0x4   :  { %188 = vmatprep.subr.bf16.mxu1 %v201_v0  ;;  %v168_v7 = vld [vmem:[%s263_s2] ss:$0 sm:$0xff] }
   0x5   :  { %v171_v19 = vld [vmem:[%s264_s4] ss:$0 sm:$0xff] }
   0x6   :  { %183 = vmatmul.mubr.msk.bf16.vlgmr.msra.gmra.mxu0 %vm39_vm2, %v196_v3 }
   0x7   :  { %189 = vmatpush3.bf16.msra.mxu1 %v198_v5 }
  0xc6   :  { %v81_v6 = vpop.f32.mrf.mxu0 }
  0xc7   :  { %v82_v10 = vadd.f32 %v168_v7, %v81_v6 }
  0xc8   :  { %v184_v8 = vpop.f32.mrf.mxu0 }
  0xca   :  { %v84_v9 = vpop.f32.mrf.mxu0 }
  0xcb   :  { %v85_v11 = vadd.f32 %v168_v7, %v84_v9 }
  0xcc   :  { %v185_v12 = vpop.f32.mrf.mxu0 }
  0xcd   :  { %v88_v13 = vpack.c.bf16 %v85_v11, %v82_v10 }
  0xcf   :  { %v90_v14 = vmul.bf16 1060454197, %v88_v13  ;;  %v89_v16 = vmul.bf16 1056980736, %v88_v13 }
  0xd1   :  { %199 = verf.bf16 %v90_v14 }
  0xdf   :  { %v200_v15 = vpop.eup %199 }
  0xe0   :  { %v92_v17 = vadd.bf16 1065369472, %v200_v15 }
  0xe2   :  { %v93_v18 = vmul.bf16 %v92_v17, %v89_v16 }
  0xe4   :  { %191 = vmatmul.mubr.msk.bf16.vlgmr.msra.gmra.mxu1 %vm117_vm3, %v93_v18 }
 0x1a4   :  { %v155_v20 = vpop.f32.mrf.mxu1 }
 0x1a5   :  { %v156_v21 = vadd.f32 %v171_v19, %v155_v20 }
 0x1a6   :  { %v192_v22 = vpop.f32.mrf.mxu1 }
 0x1a7   :  { %162 = vst.msk [vmem:[%s265_s5] sm:$0xff] %vm39_vm2, %v156_v21 }
 0x1a8   :  { %v158_v23 = vpop.f32.mrf.mxu1 }
 0x1a9   :  { %v159_v24 = vadd.f32 %v171_v19, %v158_v23 }
 0x1aa   :  { %v193_v25 = vpop.f32.mrf.mxu1 }
 0x1ab   :  { %163 = vst.msk [vmem:[%s265_s5 + $0x8] sm:$0xff] %vm39_vm2, %v159_v24 }

</bundles_post_ra>
